<compile_context>
chip_gen: v6e
topology: v6e:2x2x1
jax: 0.10.0
libtpu: 0.0.40
codegen_flags: <defaults>
</compile_context>

<pallas_src>
import functools

import numpy as np
import jax
import jax.numpy as jnp
from jax import lax
from jax.experimental import pallas as pl
from jax.experimental.pallas import tpu as pltpu


# ---------------------------------------------------------------------------
# Pallas kernel: whole BasicUnit forward for the full batch in one invocation
# ---------------------------------------------------------------------------
def _basic_unit_kernel(x_ref, w1_ref, b1_ref, w2m_ref, w3_ref, b3_ref, sel_ref,
                       o_ref, *, B, H, W):
    """x_ref : (B, Cin, H*W)      full input, channels-first, flattened spatial
       w1_ref: (Coutp, Cin)       conv1 1x1 (bn1 scale folded), left cols zero
       b1_ref: (Coutp, 1)         bn1 shift (padded rows zero)
       w2m_ref: (9, Coutp, B*H*W) per-tap depthwise weights * boundary masks
       w3_ref: (Cout, Coutp)      conv3 1x1 (bn3 scale folded), rows permuted
                                  into the post-channel_shuffle order
       b3_ref: (Cout, 1)          bn3 shift + folded bn2 shift, same permutation
       sel_ref:(Cout, Cin)        0/1 matrix scattering left channels into
                                  their shuffled output rows
       o_ref : (B, Cout, H*W)     final output (concat + shuffle already done)
    """
    HW = H * W
    N = B * HW

    # All batch images side-by-side on the lane axis: (Cin, B*HW).
    xs = [x_ref[b] for b in range(B)]
    x = xs[0] if B == 1 else jnp.concatenate(xs, axis=1)

    # ---- conv1 (1x1) + bn1 + ReLU ----------------------------------------
    t = jnp.dot(w1_ref[...], x, preferred_element_type=jnp.float32)
    t = jnp.maximum(t + b1_ref[...], 0.0)                  # (Coutp, N)

    # ---- depthwise 3x3, pad=1 (bn2 scale + boundary masks pre-baked) ------
    # Cross-image taps produced by the circular roll are exactly the
    # out-of-image taps, so the pre-baked masks zero them as well.
    acc = t * w2m_ref[4]                                   # center tap, no roll
    for k in range(9):
        if k == 4:
            continue
        dy, dx = k // 3, k % 3
        s = (dy - 1) * W + (dx - 1)                        # flat source offset
        acc = acc + pltpu.roll(t, shift=(-s) % N, axis=1) * w2m_ref[k]

    # ---- conv3 (1x1) + bn3 (+folded bn2 shift) + ReLU, rows pre-shuffled ---
    u = jnp.dot(w3_ref[...], acc, preferred_element_type=jnp.float32)
    u = jnp.maximum(u + b3_ref[...], 0.0)                  # (Cout, N); left rows are 0

    # ---- left passthrough scattered into its shuffled rows + merge --------
    out = jnp.dot(sel_ref[...], x, preferred_element_type=jnp.float32) + u

    for b in range(B):
        o_ref[b] = out[:, b * HW:(b + 1) * HW]


def basic_unit_pallas(x_flat, folded, H, W):
    """x_flat: (B, Cin, H*W) -> (B, Cout, H*W), already concat+shuffled."""
    B, Cin, HW = x_flat.shape
    Cout, Coutp = folded["w3p"].shape

    kernel = functools.partial(_basic_unit_kernel, B=B, H=H, W=W)

    flops = 2 * B * HW * (Coutp * Cin + 9 * Coutp + Cout * Coutp + Cout * Cin)
    bytes_accessed = 4 * (x_flat.size + B * Cout * HW
                          + sum(int(v.size) for v in folded.values()))

    grid_spec = pltpu.PrefetchScalarGridSpec(
        num_scalar_prefetch=0,
        grid=(1,),                                         # single step: no per-step overhead
        in_specs=[
            pl.BlockSpec((B, Cin, HW), lambda i: (0, 0, 0)),
            pl.BlockSpec(folded["w1p"].shape, lambda i: (0, 0)),
            pl.BlockSpec(folded["b1p"].shape, lambda i: (0, 0)),
            pl.BlockSpec(folded["w2m"].shape, lambda i: (0, 0, 0)),
            pl.BlockSpec(folded["w3p"].shape, lambda i: (0, 0)),
            pl.BlockSpec(folded["b3p"].shape, lambda i: (0, 0)),
            pl.BlockSpec(folded["sel"].shape, lambda i: (0, 0)),
        ],
        out_specs=pl.BlockSpec((B, Cout, HW), lambda i: (0, 0, 0)),
    )
    return pl.pallas_call(
        kernel,
        out_shape=jax.ShapeDtypeStruct((B, Cout, HW), jnp.float32),
        grid_spec=grid_spec,
        compiler_params=pltpu.CompilerParams(
            dimension_semantics=("arbitrary",)),
        cost_estimate=pl.CostEstimate(flops=flops, transcendentals=0,
                                      bytes_accessed=bytes_accessed),
    )(x_flat, folded["w1p"], folded["b1p"], folded["w2m"],
      folded["w3p"], folded["b3p"], folded["sel"])


# ---------------------------------------------------------------------------
# One-time parameter folding (runs OUTSIDE the jitted forward)
# ---------------------------------------------------------------------------
def fold_params(params, *, inplanes, outplanes, left_part, groups, B, H, W,
                eps=1e-5):
    """Fold eval-mode BN into the convs, pre-mask the depthwise taps, and
    pre-permute conv3 / bias / left-selection rows into the channel_shuffle
    output order so the kernel writes the final layout directly."""
    p = {k: np.asarray(v, dtype=np.float32) for k, v in params.items()}

    def bn_fold(prefix):
        s = p[prefix + "_gamma"] / np.sqrt(p[prefix + "_var"] + eps)
        t = p[prefix + "_beta"] - p[prefix + "_mean"] * s
        return s, t

    s1, t1 = bn_fold("bn1")
    s2, t2 = bn_fold("bn2")
    s3, t3 = bn_fold("bn3")

    cr_in = inplanes - left_part                 # right_part_in
    cr_out = outplanes - left_part               # right_part_out
    coutp = -(-cr_out // 8) * 8                  # pad branch width to full sublanes

    w1f = p["conv1_w"][:, :, 0, 0] * s1[:, None]           # (cr_out, cr_in)
    w2f = p["conv2_w"].reshape(cr_out, 9) * s2[:, None]    # (cr_out, 9), k = dy*3+dx
    w3f = p["conv3_w"][:, :, 0, 0] * s3[:, None]           # (cr_out, cr_out)
    b3v = t3 + w3f @ t2                                    # bn2 shift folded in

    # conv1 consumes the full input channel block; left columns are zero.
    w1p = np.zeros((coutp, inplanes), np.float32)
    w1p[:cr_out, left_part:] = w1f
    b1p = np.zeros((coutp, 1), np.float32)
    b1p[:cr_out, 0] = t1

    # Depthwise taps with pad=1 boundary masks pre-baked per flattened B*H*W lane.
    n = B * H * W
    idx = np.arange(n)
    h = (idx % (H * W)) // W
    w = idx % W
    w2pad = np.zeros((coutp, 9), np.float32)
    w2pad[:cr_out] = w2f
    planes = []
    for k in range(9):
        dy, dx = k // 3, k % 3
        valid = ((h >= 1 - dy) & (h <= H - dy) &
                 (w >= 1 - dx) & (w <= W - dx)).astype(np.float32)
        planes.append(w2pad[:, k:k + 1] * valid[None, :])
    w2m = np.stack(planes, axis=0)                         # (9, coutp, B*H*W)

    # channel_shuffle(concat(left, right_out), groups):
    #   output channel oc <- concat channel (oc % groups)*cpg + (oc // groups)
    cpg = outplanes // groups
    w3p = np.zeros((outplanes, coutp), np.float32)
    b3p = np.zeros((outplanes, 1), np.float32)
    sel = np.zeros((outplanes, inplanes), np.float32)
    for oc in range(outplanes):
        src = (oc % groups) * cpg + (oc // groups)
        if src < left_part:                                # left passthrough
            sel[oc, src] = 1.0
        else:                                              # right branch output
            r = src - left_part
            w3p[oc, :cr_out] = w3f[r]
            b3p[oc, 0] = b3v[r]

    out = dict(w1p=w1p, b1p=b1p, w2m=w2m, w3p=w3p, b3p=b3p, sel=sel)
    return {k: jnp.asarray(v) for k, v in out.items()}


# ---------------------------------------------------------------------------
# Forward wrapper: only free reshapes around the kernel
# ---------------------------------------------------------------------------
def basic_unit_forward(x_nchw, folded, *, H, W):
    B, C, _, _ = x_nchw.shape
    out_flat = basic_unit_pallas(x_nchw.reshape(B, C, H * W), folded, H, W)
    c_out = folded["w3p"].shape[0]
    return out_flat.reshape(B, c_out, H, W)


# ---------------------------------------------------------------------------
# Pure-JAX reference mirroring the PyTorch module (for verification)
# ---------------------------------------------------------------------------
def channel_shuffle(x, groups):
    B, C, H, W = x.shape
    x = x.reshape(B, groups, C // groups, H, W)
    x = jnp.transpose(x, (0, 2, 1, 3, 4))
    return x.reshape(B, C, H, W)


def basic_unit_reference(x_nchw, params, *, left_part, groups=2, eps=1e-5):
    left = x_nchw[:, :left_part, :, :]
    right = x_nchw[:, left_part:, :, :]

    def bn(y, prefix):
        s = params[prefix + "_gamma"] / jnp.sqrt(params[prefix + "_var"] + eps)
        t = params[prefix + "_beta"] - params[prefix + "_mean"] * s
        return y * s.reshape(1, -1, 1, 1) + t.reshape(1, -1, 1, 1)

    dn = ("NCHW", "OIHW", "NCHW")
    out = lax.conv_general_dilated(right, params["conv1_w"], (1, 1), "VALID",
                                   dimension_numbers=dn)
    out = jnp.maximum(bn(out, "bn1"), 0.0)
    out = lax.conv_general_dilated(out, params["conv2_w"], (1, 1),
                                   ((1, 1), (1, 1)), dimension_numbers=dn,
                                   feature_group_count=out.shape[1])
    out = bn(out, "bn2")
    out = lax.conv_general_dilated(out, params["conv3_w"], (1, 1), "VALID",
                                   dimension_numbers=dn)
    out = jnp.maximum(bn(out, "bn3"), 0.0)
    return channel_shuffle(jnp.concatenate((left, out), axis=1), groups)


def make_params(key, c_in_right, c_out_right):
    """Deterministic synthetic parameters in PyTorch layout."""
    ks = jax.random.split(key, 15)
    p = {
        "conv1_w": 0.2 * jax.random.normal(ks[0], (c_out_right, c_in_right, 1, 1),
                                           jnp.float32),
        "conv2_w": 0.2 * jax.random.normal(ks[1], (c_out_right, 1, 3, 3),
                                           jnp.float32),
        "conv3_w": 0.2 * jax.random.normal(ks[2], (c_out_right, c_out_right, 1, 1),
                                           jnp.float32),
    }
    for j, name in enumerate(("bn1", "bn2", "bn3")):
        i = 3 + 4 * j
        p[name + "_gamma"] = 1.0 + 0.1 * jax.random.normal(ks[i], (c_out_right,),
                                                           jnp.float32)
        p[name + "_beta"] = 0.1 * jax.random.normal(ks[i + 1], (c_out_right,),
                                                    jnp.float32)
        p[name + "_mean"] = 0.1 * jax.random.normal(ks[i + 2], (c_out_right,),
                                                    jnp.float32)
        p[name + "_var"] = jnp.abs(jax.random.normal(ks[i + 3], (c_out_right,),
                                                     jnp.float32)) + 0.5
    return p


if __name__ == "__main__":
    # BasicUnit(inplanes=8, outplanes=8, c_tag=0.5, groups=2, SE=False, residual=False)
    B, C_in, H, W = 2, 8, 16, 16
    inplanes, outplanes, c_tag, groups = C_in, 8, 0.5, 2
    left_part = round(c_tag * inplanes)              # 4
    right_part_in = inplanes - left_part             # 4
    right_part_out = outplanes - left_part           # 4

    key = jax.random.PRNGKey(0)
    kx, kp = jax.random.split(key)
    x = jax.random.normal(kx, (B, C_in, H, W), jnp.float32)
    params = make_params(kp, right_part_in, right_part_out)

    # One-time BN folding / permutation building, outside the jitted forward.
    folded = fold_params(params, inplanes=inplanes, outplanes=outplanes,
                         left_part=left_part, groups=groups, B=B, H=H, W=W)

    fwd = jax.jit(functools.partial(basic_unit_forward, H=H, W=W))
    out = fwd(x, folded)
    jax.block_until_ready(out)

    ref = basic_unit_reference(x, params, left_part=left_part, groups=groups)
    assert out.shape == (B, outplanes, H, W)
    assert jnp.allclose(out, ref, rtol=1e-4, atol=1e-4), "mismatch vs reference"

    print("KERNEL_OK")
</pallas_src>

<mosaic_0001>
module attributes {stable_mosaic.version = 11 : i64} {
  func.func @_basic_unit_kernel(%arg0: i32, %arg1: memref<2x8x256xf32, #tpu.memory_space<vmem>>, %arg2: memref<8x8xf32, #tpu.memory_space<vmem>>, %arg3: memref<8x1xf32, #tpu.memory_space<vmem>>, %arg4: memref<9x8x512xf32, #tpu.memory_space<vmem>>, %arg5: memref<8x8xf32, #tpu.memory_space<vmem>>, %arg6: memref<8x1xf32, #tpu.memory_space<vmem>>, %arg7: memref<8x8xf32, #tpu.memory_space<vmem>>, %arg8: memref<2x8x256xf32, #tpu.memory_space<vmem>>) attributes {dimension_semantics = [#tpu.dimension_semantics<arbitrary>], iteration_bounds = array<i64: 1>, scalar_prefetch = 0 : i64, scratch_operands = 0 : i64, tpu.core_type = #tpu.core_type<tc>, window_params = [{pipeline_mode = #tpu.pipeline_mode<synchronous>, transform_indices = @transform_0, window_bounds = array<i64: 2, 8, 256>}, {pipeline_mode = #tpu.pipeline_mode<synchronous>, transform_indices = @transform_1, window_bounds = array<i64: 8, 8>}, {pipeline_mode = #tpu.pipeline_mode<synchronous>, transform_indices = @transform_2, window_bounds = array<i64: 8, 1>}, {pipeline_mode = #tpu.pipeline_mode<synchronous>, transform_indices = @transform_3, window_bounds = array<i64: 9, 8, 512>}, {pipeline_mode = #tpu.pipeline_mode<synchronous>, transform_indices = @transform_4, window_bounds = array<i64: 8, 8>}, {pipeline_mode = #tpu.pipeline_mode<synchronous>, transform_indices = @transform_5, window_bounds = array<i64: 8, 1>}, {pipeline_mode = #tpu.pipeline_mode<synchronous>, transform_indices = @transform_6, window_bounds = array<i64: 8, 8>}, {pipeline_mode = #tpu.pipeline_mode<synchronous>, transform_indices = @transform_7, window_bounds = array<i64: 2, 8, 256>}]} {
    %c0 = arith.constant 0 : index
    %c0_0 = arith.constant 0 : index
    %c0_1 = arith.constant 0 : index
    %0 = vector.load %arg1[%c0, %c0_0, %c0_1] : memref<2x8x256xf32, #tpu.memory_space<vmem>>, vector<1x8x256xf32>
    %1 = vector.shape_cast %0 : vector<1x8x256xf32> to vector<8x256xf32>
    %c1 = arith.constant 1 : index
    %c0_2 = arith.constant 0 : index
    %c0_3 = arith.constant 0 : index
    %2 = vector.load %arg1[%c1, %c0_2, %c0_3] : memref<2x8x256xf32, #tpu.memory_space<vmem>>, vector<1x8x256xf32>
    %3 = vector.shape_cast %2 : vector<1x8x256xf32> to vector<8x256xf32>
    %4 = tpu.concatenate %1, %3 in 1 : vector<8x256xf32>, vector<8x256xf32> -> vector<8x512xf32>
    %c0_4 = arith.constant 0 : index
    %c0_5 = arith.constant 0 : index
    %5 = vector.load %arg2[%c0_4, %c0_5] : memref<8x8xf32, #tpu.memory_space<vmem>>, vector<8x8xf32>
    %cst = arith.constant dense<0.000000e+00> : vector<8x512xf32>
    %6 = tpu.matmul %5, %4, %cst {dimension_numbers = #tpu.dot_dimension_numbers<[1], [0], [0], [1], [0, 0, 1, 1], [], []>} : vector<8x8xf32>, vector<8x512xf32>, vector<8x512xf32> -> vector<8x512xf32>
    %c0_6 = arith.constant 0 : index
    %c0_7 = arith.constant 0 : index
    %7 = vector.load %arg3[%c0_6, %c0_7] : memref<8x1xf32, #tpu.memory_space<vmem>>, vector<8x1xf32>
    %8 = vector.broadcast %7 : vector<8x1xf32> to vector<8x512xf32>
    %9 = arith.addf %6, %8 : vector<8x512xf32>
    %cst_8 = arith.constant 0.000000e+00 : f32
    %10 = vector.broadcast %cst_8 : f32 to vector<8x512xf32>
    %11 = arith.maximumf %9, %10 : vector<8x512xf32>
    %c4 = arith.constant 4 : index
    %c0_9 = arith.constant 0 : index
    %c0_10 = arith.constant 0 : index
    %12 = vector.load %arg4[%c4, %c0_9, %c0_10] : memref<9x8x512xf32, #tpu.memory_space<vmem>>, vector<1x8x512xf32>
    %13 = vector.shape_cast %12 : vector<1x8x512xf32> to vector<8x512xf32>
    %14 = arith.mulf %11, %13 : vector<8x512xf32>
    %c17_i32 = arith.constant 17 : i32
    %15 = tpu.dynamic_rotate %11 by %c17_i32 dim 1 : vector<8x512xf32>, i32 -> vector<8x512xf32>
    %c0_11 = arith.constant 0 : index
    %c0_12 = arith.constant 0 : index
    %c0_13 = arith.constant 0 : index
    %16 = vector.load %arg4[%c0_11, %c0_12, %c0_13] : memref<9x8x512xf32, #tpu.memory_space<vmem>>, vector<1x8x512xf32>
    %17 = vector.shape_cast %16 : vector<1x8x512xf32> to vector<8x512xf32>
    %18 = arith.mulf %15, %17 : vector<8x512xf32>
    %19 = arith.addf %14, %18 : vector<8x512xf32>
    %c16_i32 = arith.constant 16 : i32
    %20 = tpu.dynamic_rotate %11 by %c16_i32 dim 1 : vector<8x512xf32>, i32 -> vector<8x512xf32>
    %c1_14 = arith.constant 1 : index
    %c0_15 = arith.constant 0 : index
    %c0_16 = arith.constant 0 : index
    %21 = vector.load %arg4[%c1_14, %c0_15, %c0_16] : memref<9x8x512xf32, #tpu.memory_space<vmem>>, vector<1x8x512xf32>
    %22 = vector.shape_cast %21 : vector<1x8x512xf32> to vector<8x512xf32>
    %23 = arith.mulf %20, %22 : vector<8x512xf32>
    %24 = arith.addf %19, %23 : vector<8x512xf32>
    %c15_i32 = arith.constant 15 : i32
    %25 = tpu.dynamic_rotate %11 by %c15_i32 dim 1 : vector<8x512xf32>, i32 -> vector<8x512xf32>
    %c2 = arith.constant 2 : index
    %c0_17 = arith.constant 0 : index
    %c0_18 = arith.constant 0 : index
    %26 = vector.load %arg4[%c2, %c0_17, %c0_18] : memref<9x8x512xf32, #tpu.memory_space<vmem>>, vector<1x8x512xf32>
    %27 = vector.shape_cast %26 : vector<1x8x512xf32> to vector<8x512xf32>
    %28 = arith.mulf %25, %27 : vector<8x512xf32>
    %29 = arith.addf %24, %28 : vector<8x512xf32>
    %c1_i32 = arith.constant 1 : i32
    %30 = tpu.dynamic_rotate %11 by %c1_i32 dim 1 : vector<8x512xf32>, i32 -> vector<8x512xf32>
    %c3 = arith.constant 3 : index
    %c0_19 = arith.constant 0 : index
    %c0_20 = arith.constant 0 : index
    %31 = vector.load %arg4[%c3, %c0_19, %c0_20] : memref<9x8x512xf32, #tpu.memory_space<vmem>>, vector<1x8x512xf32>
    %32 = vector.shape_cast %31 : vector<1x8x512xf32> to vector<8x512xf32>
    %33 = arith.mulf %30, %32 : vector<8x512xf32>
    %34 = arith.addf %29, %33 : vector<8x512xf32>
    %c511_i32 = arith.constant 511 : i32
    %35 = tpu.dynamic_rotate %11 by %c511_i32 dim 1 : vector<8x512xf32>, i32 -> vector<8x512xf32>
    %c5 = arith.constant 5 : index
    %c0_21 = arith.constant 0 : index
    %c0_22 = arith.constant 0 : index
    %36 = vector.load %arg4[%c5, %c0_21, %c0_22] : memref<9x8x512xf32, #tpu.memory_space<vmem>>, vector<1x8x512xf32>
    %37 = vector.shape_cast %36 : vector<1x8x512xf32> to vector<8x512xf32>
    %38 = arith.mulf %35, %37 : vector<8x512xf32>
    %39 = arith.addf %34, %38 : vector<8x512xf32>
    %c497_i32 = arith.constant 497 : i32
    %40 = tpu.dynamic_rotate %11 by %c497_i32 dim 1 : vector<8x512xf32>, i32 -> vector<8x512xf32>
    %c6 = arith.constant 6 : index
    %c0_23 = arith.constant 0 : index
    %c0_24 = arith.constant 0 : index
    %41 = vector.load %arg4[%c6, %c0_23, %c0_24] : memref<9x8x512xf32, #tpu.memory_space<vmem>>, vector<1x8x512xf32>
    %42 = vector.shape_cast %41 : vector<1x8x512xf32> to vector<8x512xf32>
    %43 = arith.mulf %40, %42 : vector<8x512xf32>
    %44 = arith.addf %39, %43 : vector<8x512xf32>
    %c496_i32 = arith.constant 496 : i32
    %45 = tpu.dynamic_rotate %11 by %c496_i32 dim 1 : vector<8x512xf32>, i32 -> vector<8x512xf32>
    %c7 = arith.constant 7 : index
    %c0_25 = arith.constant 0 : index
    %c0_26 = arith.constant 0 : index
    %46 = vector.load %arg4[%c7, %c0_25, %c0_26] : memref<9x8x512xf32, #tpu.memory_space<vmem>>, vector<1x8x512xf32>
    %47 = vector.shape_cast %46 : vector<1x8x512xf32> to vector<8x512xf32>
    %48 = arith.mulf %45, %47 : vector<8x512xf32>
    %49 = arith.addf %44, %48 : vector<8x512xf32>
    %c495_i32 = arith.constant 495 : i32
    %50 = tpu.dynamic_rotate %11 by %c495_i32 dim 1 : vector<8x512xf32>, i32 -> vector<8x512xf32>
    %c8 = arith.constant 8 : index
    %c0_27 = arith.constant 0 : index
    %c0_28 = arith.constant 0 : index
    %51 = vector.load %arg4[%c8, %c0_27, %c0_28] : memref<9x8x512xf32, #tpu.memory_space<vmem>>, vector<1x8x512xf32>
    %52 = vector.shape_cast %51 : vector<1x8x512xf32> to vector<8x512xf32>
    %53 = arith.mulf %50, %52 : vector<8x512xf32>
    %54 = arith.addf %49, %53 : vector<8x512xf32>
    %c0_29 = arith.constant 0 : index
    %c0_30 = arith.constant 0 : index
    %55 = vector.load %arg5[%c0_29, %c0_30] : memref<8x8xf32, #tpu.memory_space<vmem>>, vector<8x8xf32>
    %cst_31 = arith.constant dense<0.000000e+00> : vector<8x512xf32>
    %56 = tpu.matmul %55, %54, %cst_31 {dimension_numbers = #tpu.dot_dimension_numbers<[1], [0], [0], [1], [0, 0, 1, 1], [], []>} : vector<8x8xf32>, vector<8x512xf32>, vector<8x512xf32> -> vector<8x512xf32>
    %c0_32 = arith.constant 0 : index
    %c0_33 = arith.constant 0 : index
    %57 = vector.load %arg6[%c0_32, %c0_33] : memref<8x1xf32, #tpu.memory_space<vmem>>, vector<8x1xf32>
    %58 = vector.broadcast %57 : vector<8x1xf32> to vector<8x512xf32>
    %59 = arith.addf %56, %58 : vector<8x512xf32>
    %cst_34 = arith.constant 0.000000e+00 : f32
    %60 = vector.broadcast %cst_34 : f32 to vector<8x512xf32>
    %61 = arith.maximumf %59, %60 : vector<8x512xf32>
    %c0_35 = arith.constant 0 : index
    %c0_36 = arith.constant 0 : index
    %62 = vector.load %arg7[%c0_35, %c0_36] : memref<8x8xf32, #tpu.memory_space<vmem>>, vector<8x8xf32>
    %cst_37 = arith.constant dense<0.000000e+00> : vector<8x512xf32>
    %63 = tpu.matmul %62, %4, %cst_37 {dimension_numbers = #tpu.dot_dimension_numbers<[1], [0], [0], [1], [0, 0, 1, 1], [], []>} : vector<8x8xf32>, vector<8x512xf32>, vector<8x512xf32> -> vector<8x512xf32>
    %64 = arith.addf %63, %61 : vector<8x512xf32>
    %65 = vector.extract_strided_slice %64 {offsets = [0, 0], sizes = [8, 256], strides = [1, 1]} : vector<8x512xf32> to vector<8x256xf32>
    %c0_38 = arith.constant 0 : index
    %c0_39 = arith.constant 0 : index
    %c0_40 = arith.constant 0 : index
    %66 = vector.load %arg8[%c0_38, %c0_39, %c0_40] : memref<2x8x256xf32, #tpu.memory_space<vmem>>, vector<1x8x256xf32>
    %67 = vector.shape_cast %66 : vector<1x8x256xf32> to vector<8x256xf32>
    %68 = vector.shape_cast %65 : vector<8x256xf32> to vector<1x8x256xf32>
    tpu.vector_store %arg8[%c0_38, %c0_39, %c0_40], %68 {strides = array<i32>} : memref<2x8x256xf32, #tpu.memory_space<vmem>>, vector<1x8x256xf32>,
    %69 = vector.extract_strided_slice %64 {offsets = [0, 256], sizes = [8, 256], strides = [1, 1]} : vector<8x512xf32> to vector<8x256xf32>
    %c1_41 = arith.constant 1 : index
    %c0_42 = arith.constant 0 : index
    %c0_43 = arith.constant 0 : index
    %70 = vector.load %arg8[%c1_41, %c0_42, %c0_43] : memref<2x8x256xf32, #tpu.memory_space<vmem>>, vector<1x8x256xf32>
    %71 = vector.shape_cast %70 : vector<1x8x256xf32> to vector<8x256xf32>
    %72 = vector.shape_cast %69 : vector<8x256xf32> to vector<1x8x256xf32>
    tpu.vector_store %arg8[%c1_41, %c0_42, %c0_43], %72 {strides = array<i32>} : memref<2x8x256xf32, #tpu.memory_space<vmem>>, vector<1x8x256xf32>,
    return
  }
  func.func @transform_0(%arg0: i32) -> (i32, i32, i32) {
    %c0_i32 = arith.constant 0 : i32
    %c0_i32_0 = arith.constant 0 : i32
    %c0_i32_1 = arith.constant 0 : i32
    %c0_i32_2 = arith.constant 0 : i32
    return %c0_i32, %c0_i32_0, %c0_i32_1 : i32, i32, i32
  }
  func.func @transform_1(%arg0: i32) -> (i32, i32) {
    %c0_i32 = arith.constant 0 : i32
    %c0_i32_0 = arith.constant 0 : i32
    %c0_i32_1 = arith.constant 0 : i32
    return %c0_i32, %c0_i32_0 : i32, i32
  }
  func.func @transform_2(%arg0: i32) -> (i32, i32) {
    %c0_i32 = arith.constant 0 : i32
    %c0_i32_0 = arith.constant 0 : i32
    %c0_i32_1 = arith.constant 0 : i32
    return %c0_i32, %c0_i32_0 : i32, i32
  }
  func.func @transform_3(%arg0: i32) -> (i32, i32, i32) {
    %c0_i32 = arith.constant 0 : i32
    %c0_i32_0 = arith.constant 0 : i32
    %c0_i32_1 = arith.constant 0 : i32
    %c0_i32_2 = arith.constant 0 : i32
    return %c0_i32, %c0_i32_0, %c0_i32_1 : i32, i32, i32
  }
  func.func @transform_4(%arg0: i32) -> (i32, i32) {
    %c0_i32 = arith.constant 0 : i32
    %c0_i32_0 = arith.constant 0 : i32
    %c0_i32_1 = arith.constant 0 : i32
    return %c0_i32, %c0_i32_0 : i32, i32
  }
  func.func @transform_5(%arg0: i32) -> (i32, i32) {
    %c0_i32 = arith.constant 0 : i32
    %c0_i32_0 = arith.constant 0 : i32
    %c0_i32_1 = arith.constant 0 : i32
    return %c0_i32, %c0_i32_0 : i32, i32
  }
  func.func @transform_6(%arg0: i32) -> (i32, i32) {
    %c0_i32 = arith.constant 0 : i32
    %c0_i32_0 = arith.constant 0 : i32
    %c0_i32_1 = arith.constant 0 : i32
    return %c0_i32, %c0_i32_0 : i32, i32
  }
  func.func @transform_7(%arg0: i32) -> (i32, i32, i32) {
    %c0_i32 = arith.constant 0 : i32
    %c0_i32_0 = arith.constant 0 : i32
    %c0_i32_1 = arith.constant 0 : i32
    %c0_i32_2 = arith.constant 0 : i32
    return %c0_i32, %c0_i32_0, %c0_i32_1 : i32, i32, i32
  }
}

</mosaic_0001>

<bundles_post_ra>
// kernel: basic_unit_forward.1
= control target key start
LH: loop header
LB: loop body
LE: loop exit
PB: predicated region body
PF: predicated region fallthrough
CT: control target
= control target key end

     0   :  { %v771_v3 = vmov 0.0   ;;  %vm38_vm0 = vcmask 64512   ;;  %v772_v7 = vmov 0   ;;  %s776_s13 = smov 1   ;;  %s777_s14 = smov 127   ;;  %v205_v34 = vlaneseq  ;;  %s1166_s0 = inlined_call_operand.vmem [shape: f32[2,8,256], index: 0, kind: input, shape index: {}]   ;;  %s1167_s1 = inlined_call_operand.vmem [shape: f32[8,8], index: 1, kind: input, shape index: {}]   ;;  %s1168_s2 = inlined_call_operand.vmem [shape: f32[8,1], index: 2, kind: input, shape index: {}]   ;;  %s1169_s5 = inlined_call_operand.vmem [shape: f32[8,1], index: 5, kind: input, shape index: {}]   ;;  %s1170_s3 = inlined_call_operand.vmem [shape: f32[9,8,512], index: 3, kind: input, shape index: {}]   ;;  %s1171_s4 = inlined_call_operand.vmem [shape: f32[8,8], index: 4, kind: input, shape index: {}]   ;;  %s1172_s6 = inlined_call_operand.vmem [shape: f32[8,8], index: 6, kind: input, shape index: {}]   ;;  %s1173_s7 = inlined_call_operand.vmem [shape: f32[2,8,256], index: 7, kind: output, shape index: {}]  }
   0x1   :  { %v824_v0 = vld [vmem:[%s1166_s0 + $0x8] sm:$0xff]  ;;  %v829_v1 = vld [vmem:[%s1166_s0 + $0x18] sm:$0xff]  ;;  %v834_v2 = vld [vmem:[%s1166_s0] sm:$0xff]  ;;  %106 = vmatprep.mubr.f32.mxu0 %v771_v3  ;;  %177 = vmatprep.mubr.f32.mxu1 %v771_v3  ;;  %s778_s15 = smov 113   ;;  %s779_s16 = smov 112  }
   0x2   :  { %72 = vmatprep.subr.mxu0 %v824_v0  ;;  %143 = vmatprep.subr.mxu1 %v829_v1  ;;  %v843_v4 = vld [vmem:[%s1166_s0 + $0x10] sm:$0xff]  ;;  %v31_v5 = vld [vmem:[%s1167_s1] sm:$0xff]  ;;  %s773_s0 = smov 17   ;;  %s774_s1 = smov 16   ;;  %v914_v37 = vand.u32 127, %v205_v34  ;;  %v215_v45 = vld [vmem:[%s1170_s3 + $0x18] sm:$0xff] }
   0x3   :  { %73 = vmatpush1.msra.mxu0 %v834_v2  ;;  %144 = vmatpush1.msra.mxu1 %v843_v4  ;;  %v32_v6 = vld [vmem:[%s1168_s2] sm:$0xff]  ;;  %s775_s2 = smov 15   ;;  %s780_s17 = smov 111   ;;  %v724_v47 = vld [vmem:[%s1170_s3 + $0x98] sm:$0xff]  ;;  %v723_v52 = vld [vmem:[%s1170_s3 + $0x90] sm:$0xff] }
   0x4   :  { %719 = vmatmul.mubr.msk.f32.vlgmr.msra.gmra.mxu0 %vm38_vm0, %v31_v5  ;;  %720 = vmatmul.mubr.msk.f32.vlgmr.msra.gmra.mxu1 %vm38_vm0, %v31_v5  ;;  %v407_v21 = vld [vmem:[%s1169_s5] sm:$0xff]  ;;  %vm207_vm1 = vcmp.lt.s32.totalorder %v914_v37, 17  ;;  %vm232_vm2 = vcmp.lt.s32.totalorder %v914_v37, 16  ;;  %v722_v54 = vld [vmem:[%s1170_s3 + $0x88] sm:$0xff]  ;;  %v728_v57 = vld [vmem:[%s1170_s3 + $0x38] sm:$0xff]  ;;  %vm258_vm3 = vcmp.lt.s32.totalorder %v914_v37, 15 }
   0x5   :  { %769 = vset.pattern.permute.xlu0 %v772_v7  ;;  %480 = vmatprep.mubr.f32.mxu0 %v771_v3  ;;  %v212_v42 = vld [vmem:[%s1170_s3] sm:$0xff]  ;;  %v726_v62 = vld [vmem:[%s1170_s3 + $0x28] sm:$0xff]  ;;  %v727_v63 = vld [vmem:[%s1170_s3 + $0x30] sm:$0xff]  ;;  %vm284_vm4 = vcmp.lt.s32.totalorder %v914_v37, 1  ;;  %vm310_vm5 = vcmp.lt.s32.totalorder %v914_v37, 127  ;;  %vm336_vm6 = vcmp.lt.s32.totalorder %v914_v37, 113 }
   0x6   :  { %35 = vperm.xlu0 %769, %v32_v6   ;;  %551 = vmatprep.mubr.f32.mxu1 %v771_v3  ;;  %v721_v44 = vld [vmem:[%s1170_s3 + $0x80] sm:$0xff]  ;;  %vm362_vm7 = vcmp.lt.s32.totalorder %v914_v37, 112  ;;  %vm388_vm8 = vcmp.lt.s32.totalorder %v914_v37, 111 }
   0x7   :  { %770 = vset.pattern.permute.xlu1 %v772_v7  ;;  %v725_v48 = vld [vmem:[%s1170_s3 + $0x20] sm:$0xff] }
   0x8   :  { %v562_v37 = vld [vmem:[%s1172_s6] sm:$0xff] }
  0x81   :  { %v36_v8 = vpop.permute.xlu0 %35 }
  0xc4   :  { %v108_v9 = vpop.f32.mrf.mxu0  ;;  %v179_v10 = vpop.f32.mrf.mxu1 }
  0xc5   :  { %v109_v11 = vadd.f32 %v108_v9, %v36_v8  ;;  %v180_v12 = vadd.f32 %v179_v10, %v36_v8 }
  0xc6   :  { %v181_v13 = vpop.f32.mrf.mxu1  ;;  %v110_v17 = vpop.f32.mrf.mxu0 }
  0xc7   :  { %v857_v14 = vmax.f32 %v109_v11, 0.0  ;;  %v859_v15 = vmax.f32 %v180_v12, 0.0  ;;  %v182_v16 = vadd.f32 %v181_v13, %v36_v8  ;;  %v111_v18 = vadd.f32 %v110_v17, %v36_v8  ;;  %v729_v12 = vld [vmem:[%s1170_s3 + $0x40] sm:$0xff]  ;;  %v732_v13 = vld [vmem:[%s1170_s3 + $0x58] sm:$0xff]  ;;  %v730_v17 = vld [vmem:[%s1170_s3 + $0x48] sm:$0xff] }
  0xc9   :  { %201 = vrot.lane.b32.xlu1 %v859_v15, %s773_s0  ;;  %197 = vrot.lane.b32.xlu0 %v857_v14, %s773_s0  ;;  %v865_v19 = vmax.f32 %v182_v16, 0.0  ;;  %v870_v20 = vmax.f32 %v111_v18, 0.0  ;;  %v193_v55 = vmul.f32 %v721_v44, %v857_v14  ;;  %v195_v61 = vmul.f32 %v723_v52, %v859_v15 }
  0xcb   :  { %v196_v59 = vmul.f32 %v724_v47, %v865_v19  ;;  %v194_v9 = vmul.f32 %v722_v54, %v870_v20 }
  0xcd   :  { %224 = vrot.lane.b32.xlu1 %v857_v14, %s774_s1  ;;  %203 = vrot.lane.b32.xlu0 %v865_v19, %s773_s0 }
  0xd1   :  { %228 = vrot.lane.b32.xlu1 %v859_v15, %s774_s1  ;;  %226 = vrot.lane.b32.xlu0 %v870_v20, %s774_s1 }
  0xd5   :  { %250 = vrot.lane.b32.xlu1 %v857_v14, %s775_s2  ;;  %230 = vrot.lane.b32.xlu0 %v865_v19, %s774_s1 }
  0xd9   :  { %254 = vrot.lane.b32.xlu1 %v859_v15, %s775_s2  ;;  %252 = vrot.lane.b32.xlu0 %v870_v20, %s775_s2 }
  0xdd   :  { %276 = vrot.lane.b32.xlu1 %v857_v14, %s776_s13  ;;  %256 = vrot.lane.b32.xlu0 %v865_v19, %s775_s2 }
  0xe1   :  { %280 = vrot.lane.b32.xlu1 %v859_v15, %s776_s13  ;;  %278 = vrot.lane.b32.xlu0 %v870_v20, %s776_s13 }
  0xe5   :  { %302 = vrot.lane.b32.xlu1 %v857_v14, %s777_s14  ;;  %282 = vrot.lane.b32.xlu0 %v865_v19, %s776_s13 }
  0xe9   :  { %306 = vrot.lane.b32.xlu1 %v859_v15, %s777_s14  ;;  %304 = vrot.lane.b32.xlu0 %v870_v20, %s777_s14 }
  0xed   :  { %328 = vrot.lane.b32.xlu1 %v857_v14, %s778_s15  ;;  %308 = vrot.lane.b32.xlu0 %v865_v19, %s777_s14 }
  0xf1   :  { %332 = vrot.lane.b32.xlu1 %v859_v15, %s778_s15  ;;  %330 = vrot.lane.b32.xlu0 %v870_v20, %s778_s15 }
  0xf5   :  { %199 = vrot.lane.b32.xlu1 %v870_v20, %s773_s0  ;;  %334 = vrot.lane.b32.xlu0 %v865_v19, %s778_s15 }
  0xf9   :  { %354 = vrot.lane.b32.xlu1 %v857_v14, %s779_s16  ;;  %356 = vrot.lane.b32.xlu0 %v870_v20, %s779_s16 }
  0xfd   :  { %358 = vrot.lane.b32.xlu1 %v859_v15, %s779_s16  ;;  %360 = vrot.lane.b32.xlu0 %v865_v19, %s779_s16 }
 0x101   :  { %380 = vrot.lane.b32.xlu1 %v857_v14, %s780_s17  ;;  %382 = vrot.lane.b32.xlu0 %v870_v20, %s780_s17 }
 0x105   :  { %384 = vrot.lane.b32.xlu1 %v859_v15, %s780_s17  ;;  %386 = vrot.lane.b32.xlu0 %v865_v19, %s780_s17 }
 0x109   :  { %410 = vperm.xlu1 %770, %v407_v21  }
 0x13b   :  { %v904_v22 = vpop.permute.xlu1 %201  ;;  %v906_v23 = vpop.permute.xlu0 %197 }
 0x13f   :  { %v225_v24 = vpop.permute.xlu1 %224  ;;  %v204_v25 = vpop.permute.xlu0 %203 }
 0x140   :  { %v211_v43 = vsel %vm207_vm1, %v204_v25, %v906_v23  ;;  %v208_v46 = vsel %vm207_vm1, %v904_v22, %v204_v25  ;;  %v213_v25 = vld [vmem:[%s1170_s3 + $0x8] sm:$0xff] }
 0x141   :  { %v216_v53 = vmul.f32 %v212_v42, %v211_v43  ;;  %v219_v56 = vmul.f32 %v215_v45, %v208_v46 }
 0x143   :  { %v229_v26 = vpop.permute.xlu1 %228  ;;  %v227_v27 = vpop.permute.xlu0 %226  ;;  %v220_v10 = vadd.f32 %v216_v53, %v193_v55  ;;  %v223_v16 = vadd.f32 %v219_v56, %v196_v59  ;;  %v740_v56 = vld [vmem:[%s1170_s3 + $0xb8] sm:$0xff] }
 0x144   :  { %v234_v5 = vsel %vm232_vm2, %v227_v27, %v229_v26  ;;  %v235_v6 = vsel %vm232_vm2, %v225_v24, %v227_v27  ;;  %v731_v27 = vld [vmem:[%s1170_s3 + $0x50] sm:$0xff] }
 0x145   :  { %v243_v19 = vmul.f32 %v726_v62, %v235_v6  ;;  %v244_v20 = vmul.f32 %v727_v63, %v234_v5 }
 0x147   :  { %v251_v28 = vpop.permute.xlu1 %250  ;;  %v231_v29 = vpop.permute.xlu0 %230 }
 0x148   :  { %v236_v49 = vsel %vm232_vm2, %v231_v29, %v225_v24  ;;  %v233_v58 = vsel %vm232_vm2, %v229_v26, %v231_v29  ;;  %v214_v26 = vld [vmem:[%s1170_s3 + $0x10] sm:$0xff] }
 0x149   :  { %v242_v60 = vmul.f32 %v725_v48, %v236_v49  ;;  %v245_v11 = vmul.f32 %v728_v57, %v233_v58  ;;  %v734_v48 = vld [vmem:[%s1170_s3 + $0x68] sm:$0xff] }
 0x14b   :  { %v255_v30 = vpop.permute.xlu1 %254  ;;  %v253_v31 = vpop.permute.xlu0 %252  ;;  %v246_v21 = vadd.f32 %v242_v60, %v220_v10  ;;  %v249_v44 = vadd.f32 %v245_v11, %v223_v16  ;;  %v737_v10 = vld [vmem:[%s1170_s3 + $0xa0] sm:$0xff]  ;;  %v744_v16 = vld [vmem:[%s1170_s3 + $0xd8] sm:$0xff] }
 0x14c   :  { %v261_v18 = vsel %vm258_vm3, %v251_v28, %v253_v31  ;;  %v260_v24 = vsel %vm258_vm3, %v253_v31, %v255_v30 }
 0x14d   :  { %v269_v45 = vmul.f32 %v730_v17, %v261_v18  ;;  %v270_v53 = vmul.f32 %v731_v27, %v260_v24 }
 0x14f   :  { %v908_v32 = vpop.permute.xlu1 %276  ;;  %v257_v33 = vpop.permute.xlu0 %256 }
 0x150   :  { %v259_v14 = vsel %vm258_vm3, %v255_v30, %v257_v33  ;;  %v262_v15 = vsel %vm258_vm3, %v257_v33, %v251_v28  ;;  %v733_v33 = vld [vmem:[%s1170_s3 + $0x60] sm:$0xff]  ;;  %v736_v30 = vld [vmem:[%s1170_s3 + $0x78] sm:$0xff] }
 0x151   :  { %v268_v28 = vmul.f32 %v729_v12, %v262_v15  ;;  %v271_v29 = vmul.f32 %v732_v13, %v259_v14 }
 0x153   :  { %v910_v35 = vpop.permute.xlu1 %280  ;;  %v912_v36 = vpop.permute.xlu0 %278  ;;  %v272_v57 = vadd.f32 %v268_v28, %v246_v21  ;;  %v275_v58 = vadd.f32 %v271_v29, %v249_v44  ;;  %v743_v21 = vld [vmem:[%s1170_s3 + $0xd0] sm:$0xff] }
 0x154   :  { %v286_v49 = vsel %vm284_vm4, %v912_v36, %v910_v35 }
 0x157   :  { %v916_v38 = vpop.permute.xlu1 %302  ;;  %v283_v39 = vpop.permute.xlu0 %282 }
 0x158   :  { %v285_v31 = vsel %vm284_vm4, %v910_v35, %v283_v39  ;;  %v288_v34 = vsel %vm284_vm4, %v283_v39, %v908_v32  ;;  %v735_v39 = vld [vmem:[%s1170_s3 + $0x70] sm:$0xff] }
 0x159   :  { %v294_v54 = vmul.f32 %v733_v33, %v288_v34  ;;  %v297_v55 = vmul.f32 %v736_v30, %v285_v31  ;;  %v296_v63 = vmul.f32 %v735_v39, %v286_v49  ;;  %v748_v33 = vld [vmem:[%s1170_s3 + $0xf8] sm:$0xff] }
 0x15b   :  { %v919_v40 = vpop.permute.xlu1 %306  ;;  %v921_v41 = vpop.permute.xlu0 %304  ;;  %v301_v14 = vadd.f32 %v297_v55, %v275_v58 }
 0x15c   :  { %v312_v5 = vsel %vm310_vm5, %v921_v41, %v919_v40  ;;  %v313_v6 = vsel %vm310_vm5, %v916_v38, %v921_v41  ;;  %v298_v41 = vadd.f32 %v294_v54, %v272_v57  ;;  %v749_v54 = vld [vmem:[%s1170_s3 + $0x100] sm:$0xff] }
 0x15d   :  { %v320_v27 = vmul.f32 %v737_v10, %v313_v6 }
 0x15f   :  { %v947_v50 = vpop.permute.xlu1 %328  ;;  %v949_v51 = vpop.permute.xlu0 %308 }
 0x160   :  { %v314_v35 = vsel %vm310_vm5, %v949_v51, %v916_v38  ;;  %v311_v11 = vsel %vm310_vm5, %v919_v40, %v949_v51  ;;  %v741_v40 = vld [vmem:[%s1170_s3 + $0xc0] sm:$0xff]  ;;  %v742_v51 = vld [vmem:[%s1170_s3 + $0xc8] sm:$0xff] }
 0x161   :  { %v323_v12 = vmul.f32 %v740_v56, %v314_v35  ;;  %v324_v56 = vadd.f32 %v320_v27, %v298_v41 }
 0x163   :  { %v977_v7 = vpop.permute.xlu1 %332  ;;  %v979_v8 = vpop.permute.xlu0 %330 }
 0x164   :  { %v338_v15 = vsel %vm336_vm6, %v979_v8, %v977_v7  ;;  %v339_v18 = vsel %vm336_vm6, %v947_v50, %v979_v8  ;;  %v327_v8 = vadd.f32 %v323_v12, %v301_v14 }
 0x165   :  { %v347_v44 = vmul.f32 %v742_v51, %v338_v15 }
 0x167   :  { %v200_v42 = vpop.permute.xlu1 %199  ;;  %v335_v43 = vpop.permute.xlu0 %334 }
 0x168   :  { %v209_v46 = vsel %vm207_vm1, %v200_v42, %v904_v22  ;;  %v210_v47 = vsel %vm207_vm1, %v906_v23, %v200_v42  ;;  %v287_v22 = vsel %vm284_vm4, %v908_v32, %v912_v36  ;;  %v340_v17 = vsel %vm336_vm6, %v335_v43, %v947_v50 }
 0x169   :  { %v217_v52 = vmul.f32 %v213_v25, %v210_v47  ;;  %v218_v23 = vmul.f32 %v214_v26, %v209_v46  ;;  %v295_v62 = vmul.f32 %v734_v48, %v287_v22  ;;  %v337_v24 = vsel %vm336_vm6, %v977_v7, %v335_v43  ;;  %v745_v46 = vld [vmem:[%s1170_s3 + $0xe0] sm:$0xff]  ;;  %v746_v47 = vld [vmem:[%s1170_s3 + $0xe8] sm:$0xff] }
 0x16a   :  { %v349_v31 = vmul.f32 %v744_v16, %v340_v17  ;;  %v346_v42 = vmul.f32 %v741_v40, %v339_v18 }
 0x16b   :  { %v221_v59 = vadd.f32 %v217_v52, %v194_v9  ;;  %v222_v32 = vadd.f32 %v218_v23, %v195_v61  ;;  %v355_v36 = vpop.permute.xlu1 %354  ;;  %v357_v60 = vpop.permute.xlu0 %356  ;;  %v738_v61 = vld [vmem:[%s1170_s3 + $0xa8] sm:$0xff]  ;;  %v739_v9 = vld [vmem:[%s1170_s3 + $0xb0] sm:$0xff] }
 0x16c   :  { %v321_v28 = vmul.f32 %v738_v61, %v312_v5  ;;  %v322_v29 = vmul.f32 %v739_v9, %v311_v11  ;;  %v365_v7 = vsel %vm362_vm7, %v355_v36, %v357_v60  ;;  %v747_v23 = vld [vmem:[%s1170_s3 + $0xf0] sm:$0xff]  ;;  %v353_v57 = vadd.f32 %v349_v31, %v327_v8 }
 0x16d   :  { %v247_v13 = vadd.f32 %v243_v19, %v221_v59  ;;  %v248_v38 = vadd.f32 %v244_v20, %v222_v32  ;;  %v372_v59 = vmul.f32 %v745_v46, %v365_v7 }
 0x16f   :  { %v273_v19 = vadd.f32 %v269_v45, %v247_v13  ;;  %v274_v20 = vadd.f32 %v270_v53, %v248_v38  ;;  %v359_v25 = vpop.permute.xlu1 %358  ;;  %v361_v26 = vpop.permute.xlu0 %360  ;;  %v348_v45 = vmul.f32 %v743_v21, %v337_v24 }
 0x170   :  { %v366_v50 = vsel %vm362_vm7, %v361_v26, %v355_v36  ;;  %v364_v39 = vsel %vm362_vm7, %v357_v60, %v359_v25  ;;  %v363_v53 = vsel %vm362_vm7, %v359_v25, %v361_v26  ;;  %v750_v36 = vld [vmem:[%s1170_s3 + $0x108] sm:$0xff]  ;;  %v751_v60 = vld [vmem:[%s1170_s3 + $0x110] sm:$0xff] }
 0x171   :  { %v300_v30 = vadd.f32 %v296_v63, %v274_v20  ;;  %v299_v34 = vadd.f32 %v295_v62, %v273_v19  ;;  %v375_v49 = vmul.f32 %v748_v33, %v366_v50  ;;  %v373_v32 = vmul.f32 %v746_v47, %v364_v39  ;;  %v752_v62 = vld [vmem:[%s1170_s3 + $0x118] sm:$0xff]  ;;  %v406_v20 = vld [vmem:[%s1171_s4] sm:$0xff] }
 0x172   :  { %v350_v63 = vadd.f32 %v346_v42, %v324_v56  ;;  %v374_v5 = vmul.f32 %v747_v23, %v363_v53 }
 0x173   :  { %v326_v43 = vadd.f32 %v322_v29, %v300_v30  ;;  %v325_v48 = vadd.f32 %v321_v28, %v299_v34  ;;  %v381_v22 = vpop.permute.xlu1 %380  ;;  %v383_v52 = vpop.permute.xlu0 %382  ;;  %v379_v6 = vadd.f32 %v375_v49, %v353_v57 }
 0x174   :  { %v391_v55 = vsel %vm388_vm8, %v381_v22, %v383_v52  ;;  %v376_v17 = vadd.f32 %v372_v59, %v350_v63 }
 0x175   :  { %v352_v35 = vadd.f32 %v348_v45, %v326_v43  ;;  %v351_v58 = vadd.f32 %v347_v44, %v325_v48  ;;  %v398_v10 = vmul.f32 %v749_v54, %v391_v55 }
 0x177   :  { %v385_v61 = vpop.permute.xlu1 %384  ;;  %v387_v9 = vpop.permute.xlu0 %386  ;;  %v377_v11 = vadd.f32 %v373_v32, %v351_v58  ;;  %v378_v41 = vadd.f32 %v374_v5, %v352_v35  ;;  %v402_v19 = vadd.f32 %v398_v10, %v376_v17 }
 0x178   :  { %v390_v12 = vsel %vm388_vm8, %v383_v52, %v385_v61  ;;  %v389_v13 = vsel %vm388_vm8, %v385_v61, %v387_v9  ;;  %v392_v38 = vsel %vm388_vm8, %v387_v9, %v381_v22 }
 0x179   :  { %v399_v14 = vmul.f32 %v750_v36, %v390_v12  ;;  %v400_v15 = vmul.f32 %v751_v60, %v389_v13  ;;  %v401_v16 = vmul.f32 %v752_v62, %v392_v38 }
 0x17b   :  { %v404_v40 = vadd.f32 %v400_v15, %v378_v41  ;;  %v403_v51 = vadd.f32 %v399_v14, %v377_v11  ;;  %v405_v18 = vadd.f32 %v401_v16, %v379_v6 }
 0x17d   :  { %446 = vmatprep.subr.mxu0 %v403_v51  ;;  %517 = vmatprep.subr.mxu1 %v405_v18 }
 0x17e   :  { %447 = vmatpush1.msra.mxu0 %v402_v19  ;;  %518 = vmatpush1.msra.mxu1 %v404_v40 }
 0x17f   :  { %753 = vmatmul.mubr.msk.f32.vlgmr.msra.gmra.mxu0 %vm38_vm0, %v406_v20  ;;  %754 = vmatmul.mubr.msk.f32.vlgmr.msra.gmra.mxu1 %vm38_vm0, %v406_v20 }
 0x180   :  { %596 = vmatprep.subr.mxu0 %v824_v0  ;;  %667 = vmatprep.subr.mxu1 %v829_v1 }
 0x181   :  { %597 = vmatpush1.msra.mxu0 %v834_v2  ;;  %668 = vmatpush1.msra.mxu1 %v843_v4 }
 0x182   :  { %630 = vmatprep.mubr.f32.mxu0 %v771_v3  ;;  %701 = vmatprep.mubr.f32.mxu1 %v771_v3 }
 0x183   :  { %755 = vmatmul.mubr.msk.f32.vlgmr.msra.gmra.mxu0 %vm38_vm0, %v562_v37  ;;  %756 = vmatmul.mubr.msk.f32.vlgmr.msra.gmra.mxu1 %vm38_vm0, %v562_v37 }
 0x184   :  { %v411_v21 = vpop.permute.xlu1 %410 }
 0x23f   :  { %v482_v0 = vpop.f32.mrf.mxu0  ;;  %v553_v24 = vpop.f32.mrf.mxu1 }
 0x240   :  { %v483_v1 = vadd.f32 %v482_v0, %v411_v21  ;;  %v554_v25 = vadd.f32 %v553_v24, %v411_v21 }
 0x241   :  { %v484_v26 = vpop.f32.mrf.mxu0  ;;  %v555_v27 = vpop.f32.mrf.mxu1 }
 0x242   :  { %v485_v28 = vadd.f32 %v484_v26, %v411_v21  ;;  %v556_v29 = vadd.f32 %v555_v27, %v411_v21  ;;  %v558_v2 = vmax.f32 %v483_v1, 0.0  ;;  %v560_v33 = vmax.f32 %v554_v25, 0.0 }
 0x243   :  { %v632_v4 = vpop.f32.mrf.mxu0  ;;  %v703_v50 = vpop.f32.mrf.mxu1 }
 0x244   :  { %v559_v8 = vmax.f32 %v485_v28, 0.0  ;;  %v561_v30 = vmax.f32 %v556_v29, 0.0  ;;  %v633_v3 = vadd.f32 %v632_v4, %v558_v2  ;;  %v704_v31 = vadd.f32 %v703_v50, %v560_v33 }
 0x245   :  { %v634_v34 = vpop.f32.mrf.mxu0  ;;  %v705_v42 = vpop.f32.mrf.mxu1 }
 0x246   :  { %708 = vst [vmem:[%s1173_s7] sm:$0xff] %v633_v3  ;;  %757 = vst [vmem:[%s1173_s7 + $0x10] sm:$0xff] %v704_v31  ;;  %v635_v44 = vadd.f32 %v634_v34, %v559_v8  ;;  %v706_v45 = vadd.f32 %v705_v42, %v561_v30 }
 0x248   :  { %709 = vst [vmem:[%s1173_s7 + $0x8] sm:$0xff] %v635_v44  ;;  %758 = vst [vmem:[%s1173_s7 + $0x18] sm:$0xff] %v706_v45 }

</bundles_post_ra>
